<compile_context>
chip_gen: v5e
topology: v5e:2x2
jax: 0.10.0
libtpu: 0.0.40
codegen_flags: <defaults>
</compile_context>

<pallas_src>
import functools

import jax
import jax.numpy as jnp
from jax.experimental import pallas as pl
from jax.experimental.pallas import tpu as pltpu


def _round_up(x: int, m: int) -> int:
    return (x + m - 1) // m * m


def _pick_dim_tiling(dim: int, base: int, max_tile: int):
    """Pad `dim` only to the hardware minimum (`base`) and pick a tile.

    Returns (padded_dim, tile) with tile a multiple of `base`, tile <= max_tile,
    and padded_dim an exact multiple of tile.  Prefers the largest tile whose
    extra padding is <= ~12.5% of the dim; otherwise minimizes total padding.
    """
    dp = _round_up(dim, base)
    if dp <= max_tile:
        return dp, dp                      # single lane/sublane-aligned block
    budget = dp // 8
    best_total, best_t = None, None
    t = max(base, (max_tile // base) * base)
    while t >= base:
        total = _round_up(dp, t)
        if total - dp <= budget:
            return total, t                # largest tile within the waste budget
        if best_total is None or total < best_total:
            best_total, best_t = total, t
        t -= base
    return best_total, best_t              # unreachable (t=base always divides dp)


# --------------------------------------------------------------------------
# Kernels.  x tile: [tm, tk]; weight tile (pre-transposed [I, O]): [tk, tn];
# bias tile: [1, tn] f32; K (reduction) is the innermost grid axis.
# --------------------------------------------------------------------------
def _fc_kernel_direct(x_ref, w_ref, b_ref, o_ref, *, activate: bool):
    """f32 output: accumulate directly into the resident output block."""
    k = pl.program_id(2)

    @pl.when(k == 0)
    def _init():
        o_ref[...] = jnp.zeros_like(o_ref)

    xv = x_ref[...]
    if activate:
        # tanh runs on the EUP slot; recomputed per N block (low priority while
        # the MXU is the binding unit — see perf review).
        xv = jnp.tanh(xv)
    if xv.dtype != w_ref.dtype:
        xv = xv.astype(w_ref.dtype)        # e.g. f32 -> bf16 for the MXU fast path

    o_ref[...] += jnp.dot(xv, w_ref[...], preferred_element_type=jnp.float32)

    @pl.when(k == pl.num_programs(2) - 1)
    def _finalize():
        o_ref[...] += b_ref[...]           # bias added exactly once


def _fc_kernel_acc(x_ref, w_ref, b_ref, o_ref, acc_ref, *, activate: bool):
    """Non-f32 output: keep a resident f32 VMEM accumulator, cast at the end."""
    k = pl.program_id(2)

    @pl.when(k == 0)
    def _init():
        acc_ref[...] = jnp.zeros_like(acc_ref)

    xv = x_ref[...]
    if activate:
        xv = jnp.tanh(xv)
    if xv.dtype != w_ref.dtype:
        xv = xv.astype(w_ref.dtype)

    acc_ref[...] += jnp.dot(xv, w_ref[...], preferred_element_type=jnp.float32)

    @pl.when(k == pl.num_programs(2) - 1)
    def _finalize():
        o_ref[...] = (acc_ref[...] + b_ref[...]).astype(o_ref.dtype)


# --------------------------------------------------------------------------
# One-time parameter preparation (outside the per-step hot path).
# --------------------------------------------------------------------------
def prepare_fc_params(weight, bias, *, param_dtype=None,
                      tn_max: int = 512, tk_max: int = 512,
                      ensure_two_n_blocks: bool = True):
    """Pad, transpose and (optionally) down-cast the nn.Linear parameters ONCE.

    Args:
      weight: [output_size, input_size]  (PyTorch nn.Linear layout)
      bias:   [output_size]
      param_dtype: optional storage/compute dtype for the weight (e.g. bf16).
      ensure_two_n_blocks: cap tn so O yields >= 2 N blocks when possible, so
        small-batch calls still shard across both v7x TensorCores.
    """
    O, I = weight.shape
    assert bias.shape == (O,)

    Op0 = _round_up(O, 128)
    tn_cap = tn_max
    if ensure_two_n_blocks and Op0 >= 256:
        tn_cap = min(tn_max, max(128, (Op0 // 2) // 128 * 128))
    Op, tn = _pick_dim_tiling(O, 128, tn_cap)
    Ip, tk = _pick_dim_tiling(I, 128, tk_max)

    w = weight if param_dtype is None else weight.astype(param_dtype)
    # Zero-pad then transpose to [Ip, Op]: padded K rows / N cols are zero, so
    # the K reduction stays exact and padded outputs are sliced off later.
    w_t = jnp.zeros((Ip, Op), w.dtype).at[:I, :O].set(w.T)
    b_p = jnp.zeros((1, Op), jnp.float32).at[0, :O].set(bias.astype(jnp.float32))

    return {"w": w_t, "b": b_p, "in_features": I, "out_features": O,
            "tn": tn, "tk": tk}


# --------------------------------------------------------------------------
# Forward pass.
# --------------------------------------------------------------------------
def fc_forward(x, params, *, activate: bool = False, tm_max: int = 512):
    """Pallas implementation of FC.forward (dropout p=0.0 is identity).

    Args:
      x: [B, input_size]
      params: dict from prepare_fc_params (weight already padded/transposed).
    Returns:
      [B, output_size] in x.dtype.
    """
    B, I = x.shape
    assert I == params["in_features"], (I, params["in_features"])
    w_t, b_p = params["w"], params["b"]
    Ip, Op = w_t.shape
    tn, tk = params["tn"], params["tk"]
    O = params["out_features"]

    Bp, tm = _pick_dim_tiling(B, 8, tm_max)
    xp = x if (Bp == B and Ip == I) else jnp.pad(x, ((0, Bp - B), (0, Ip - I)))

    grid = (Bp // tm, Op // tn, Ip // tk)
    n_i, n_j, n_k = grid

    out_dtype = x.dtype
    use_scratch = out_dtype != jnp.float32
    kernel = functools.partial(
        _fc_kernel_acc if use_scratch else _fc_kernel_direct, activate=activate)
    scratch_shapes = [pltpu.VMEM((tm, tn), jnp.float32)] if use_scratch else []

    flops = 2 * Bp * Ip * Op
    transcendentals = Bp * Ip * n_j if activate else 0
    bytes_accessed = (xp.size * xp.dtype.itemsize * n_j        # x re-read per N block
                      + w_t.size * w_t.dtype.itemsize * n_i    # w re-read per M block
                      + b_p.size * b_p.dtype.itemsize
                      + Bp * Op * jnp.dtype(out_dtype).itemsize)

    out_padded = pl.pallas_call(
        kernel,
        out_shape=jax.ShapeDtypeStruct((Bp, Op), out_dtype),
        grid_spec=pltpu.PrefetchScalarGridSpec(
            num_scalar_prefetch=0,
            grid=grid,
            in_specs=[
                # x tile depends on (i, k).
                pl.BlockSpec((tm, tk), lambda i, j, k: (i, k)),
                # pre-transposed weight tile depends only on (k, j).
                pl.BlockSpec((tk, tn), lambda i, j, k: (k, j)),
                # bias tile depends only on j; added once at k == last.
                pl.BlockSpec((1, tn), lambda i, j, k: (0, j)),
            ],
            out_specs=pl.BlockSpec((tm, tn), lambda i, j, k: (i, j)),
            scratch_shapes=scratch_shapes,
        ),
        compiler_params=pltpu.CompilerParams(
            dimension_semantics=("parallel", "parallel", "arbitrary"),
            vmem_limit_bytes=32 * 1024 * 1024),
        cost_estimate=pl.CostEstimate(
            flops=flops,
            transcendentals=transcendentals,
            bytes_accessed=bytes_accessed),
    )(xp, w_t, b_p)

    if Bp == B and Op == O:
        return out_padded
    return out_padded[:B, :O]


def init_fc_params(key, input_size, output_size, dtype=jnp.float32):
    """Deterministic nn.Linear-style init: U(-1/sqrt(in), 1/sqrt(in))."""
    kw, kb = jax.random.split(key)
    bound = 1.0 / (input_size ** 0.5)
    weight = jax.random.uniform(kw, (output_size, input_size), dtype,
                                minval=-bound, maxval=bound)
    bias = jax.random.uniform(kb, (output_size,), dtype,
                              minval=-bound, maxval=bound)
    return weight, bias


if __name__ == "__main__":
    key = jax.random.PRNGKey(0)
    k_x, k_p = jax.random.split(key)

    # --- Test 1: small shape, tanh branch, f32 -----------------------------
    B, INPUT_SIZE, OUTPUT_SIZE = 8, 32, 16
    x = jax.random.normal(k_x, (B, INPUT_SIZE), jnp.float32)
    weight, bias = init_fc_params(k_p, INPUT_SIZE, OUTPUT_SIZE)

    params = prepare_fc_params(weight, bias)            # one-time prep
    out = jax.block_until_ready(fc_forward(x, params, activate=True))
    ref = jnp.tanh(x) @ weight.T + bias
    assert out.shape == (B, OUTPUT_SIZE)
    assert jnp.allclose(out, ref, atol=1e-5, rtol=1e-5), "mismatch vs reference"

    # --- Test 2: awkward shape exercising a real (M, N, K) grid, f32 -------
    B2, I2, O2 = 520, 1030, 770
    x2 = jax.random.normal(jax.random.PRNGKey(1), (B2, I2), jnp.float32)
    w2, b2 = init_fc_params(jax.random.PRNGKey(2), I2, O2)
    params2 = prepare_fc_params(w2, b2)
    out2 = jax.block_until_ready(fc_forward(x2, params2, activate=False))
    ref2 = x2 @ w2.T + b2
    assert out2.shape == (B2, O2)
    assert jnp.allclose(out2, ref2, atol=2e-4, rtol=2e-4), "tiled mismatch"

    # --- Test 3: bf16 weights (native MXU path, half the weight HBM) -------
    params2_bf16 = prepare_fc_params(w2, b2, param_dtype=jnp.bfloat16)
    out3 = jax.block_until_ready(fc_forward(x2, params2_bf16, activate=False))
    ref3 = jnp.dot(x2.astype(jnp.bfloat16), w2.T.astype(jnp.bfloat16),
                   preferred_element_type=jnp.float32) + b2
    assert out3.shape == (B2, O2)
    assert jnp.allclose(out3, ref3, atol=1e-2, rtol=1e-2), "bf16 mismatch"

    print("KERNEL_OK")
</pallas_src>

<mosaic_0001>
module attributes {stable_mosaic.version = 11 : i64} {
  func.func @_fc_kernel_direct(%arg0: i32, %arg1: i32, %arg2: i32, %arg3: memref<8x128xf32, #tpu.memory_space<vmem>>, %arg4: memref<128x128xf32, #tpu.memory_space<vmem>>, %arg5: memref<1x128xf32, #tpu.memory_space<vmem>>, %arg6: memref<8x128xf32, #tpu.memory_space<vmem>>) attributes {dimension_semantics = [#tpu.dimension_semantics<parallel>, #tpu.dimension_semantics<parallel>, #tpu.dimension_semantics<arbitrary>], iteration_bounds = array<i64: 1, 1, 1>, scalar_prefetch = 0 : i64, scratch_operands = 0 : i64, tpu.core_type = #tpu.core_type<tc>, window_params = [{transform_indices = @transform_0, window_bounds = array<i64: 8, 128>}, {transform_indices = @transform_1, window_bounds = array<i64: 128, 128>}, {transform_indices = @transform_2, window_bounds = array<i64: 1, 128>}, {transform_indices = @transform_3, window_bounds = array<i64: 8, 128>}]} {
    %c0_i32 = arith.constant 0 : i32
    %0 = arith.cmpi eq, %arg2, %c0_i32 : i32
    %1 = arith.extui %0 : i1 to i32
    %c0_i32_0 = arith.constant 0 : i32
    %2 = arith.cmpi ne, %1, %c0_i32_0 : i32
    scf.if %2 {
      %cst_10 = arith.constant 0.000000e+00 : f32
      %13 = vector.broadcast %cst_10 : f32 to vector<8x128xf32>
      %c0_11 = arith.constant 0 : index
      %c0_12 = arith.constant 0 : index
      %14 = vector.load %arg6[%c0_11, %c0_12] : memref<8x128xf32, #tpu.memory_space<vmem>>, vector<8x128xf32>
      tpu.vector_store %arg6[%c0_11, %c0_12], %13 {strides = array<i32>} : memref<8x128xf32, #tpu.memory_space<vmem>>, vector<8x128xf32>,
    } else {
    }
    %c0 = arith.constant 0 : index
    %c0_1 = arith.constant 0 : index
    %3 = vector.load %arg3[%c0, %c0_1] : memref<8x128xf32, #tpu.memory_space<vmem>>, vector<8x128xf32>
    %4 = math.tanh %3 : vector<8x128xf32>
    %c0_2 = arith.constant 0 : index
    %c0_3 = arith.constant 0 : index
    %5 = vector.load %arg6[%c0_2, %c0_3] : memref<8x128xf32, #tpu.memory_space<vmem>>, vector<8x128xf32>
    %c0_4 = arith.constant 0 : index
    %c0_5 = arith.constant 0 : index
    %6 = vector.load %arg4[%c0_4, %c0_5] : memref<128x128xf32, #tpu.memory_space<vmem>>, vector<128x128xf32>
    %cst = arith.constant dense<0.000000e+00> : vector<8x128xf32>
    %7 = tpu.matmul %4, %6, %cst {dimension_numbers = #tpu.dot_dimension_numbers<[1], [0], [0], [1], [0, 0, 1, 1], [], []>} : vector<8x128xf32>, vector<128x128xf32>, vector<8x128xf32> -> vector<8x128xf32>
    %8 = arith.addf %5, %7 : vector<8x128xf32>
    %c0_6 = arith.constant 0 : index
    %c0_7 = arith.constant 0 : index
    %9 = vector.load %arg6[%c0_6, %c0_7] : memref<8x128xf32, #tpu.memory_space<vmem>>, vector<8x128xf32>
    tpu.vector_store %arg6[%c0_6, %c0_7], %8 {strides = array<i32>} : memref<8x128xf32, #tpu.memory_space<vmem>>, vector<8x128xf32>,
    %c0_i32_8 = arith.constant 0 : i32
    %10 = arith.cmpi eq, %arg2, %c0_i32_8 : i32
    %11 = arith.extui %10 : i1 to i32
    %c0_i32_9 = arith.constant 0 : i32
    %12 = arith.cmpi ne, %11, %c0_i32_9 : i32
    scf.if %12 {
      %c0_10 = arith.constant 0 : index
      %c0_11 = arith.constant 0 : index
      %13 = vector.load %arg6[%c0_10, %c0_11] : memref<8x128xf32, #tpu.memory_space<vmem>>, vector<8x128xf32>
      %c0_12 = arith.constant 0 : index
      %c0_13 = arith.constant 0 : index
      %14 = vector.load %arg5[%c0_12, %c0_13] : memref<1x128xf32, #tpu.memory_space<vmem>>, vector<1x128xf32>
      %15 = vector.broadcast %14 : vector<1x128xf32> to vector<8x128xf32>
      %16 = arith.addf %13, %15 : vector<8x128xf32>
      %c0_14 = arith.constant 0 : index
      %c0_15 = arith.constant 0 : index
      %17 = vector.load %arg6[%c0_14, %c0_15] : memref<8x128xf32, #tpu.memory_space<vmem>>, vector<8x128xf32>
      tpu.vector_store %arg6[%c0_14, %c0_15], %16 {strides = array<i32>} : memref<8x128xf32, #tpu.memory_space<vmem>>, vector<8x128xf32>,
    } else {
    }
    return
  }
  func.func @transform_0(%arg0: i32, %arg1: i32, %arg2: i32) -> (i32, i32) {
    %c0_i32 = arith.constant 0 : i32
    return %arg0, %arg2 : i32, i32
  }
  func.func @transform_1(%arg0: i32, %arg1: i32, %arg2: i32) -> (i32, i32) {
    %c0_i32 = arith.constant 0 : i32
    return %arg2, %arg1 : i32, i32
  }
  func.func @transform_2(%arg0: i32, %arg1: i32, %arg2: i32) -> (i32, i32) {
    %c0_i32 = arith.constant 0 : i32
    %c0_i32_0 = arith.constant 0 : i32
    return %c0_i32, %arg1 : i32, i32
  }
  func.func @transform_3(%arg0: i32, %arg1: i32, %arg2: i32) -> (i32, i32) {
    %c0_i32 = arith.constant 0 : i32
    return %arg0, %arg1 : i32, i32
  }
}

</mosaic_0001>

<bundles_post_ra>
// kernel: tpu_custom_call.1
= control target key start
LH: loop header
LB: loop body
LE: loop exit
PB: predicated region body
PF: predicated region fallthrough
CT: control target
= control target key end

     0   :  { %8 = vsyncpa [#allocation3], 0  ;;  %s243_s0 = inlined_call_operand.hbm [shape: f32[8,128], index: 0, kind: input, shape index: {}]   ;;  %s244_s1 = inlined_call_operand.hbm [shape: f32[128,128], index: 1, kind: input, shape index: {}]   ;;  %s245_s2 = inlined_call_operand.vmem [shape: f32[1,128], index: 2, kind: input, shape index: {}]   ;;  %s246_s3 = inlined_call_operand.hbm [shape: f32[8,128], index: 3, kind: output, shape index: {}]  }
   0x1   :  { %9 = vsyncpa [#allocation6], 0 }
   0x2   :  { %10 = vsyncpa [#allocation4], 0  ;;  %s16_s14 = sshll.u32 %s243_s0, 4  ;;  %s206_s15 = smov [#allocation2]   ;;  %s17_s14 = int_to_ptr.hbm [resolvable:$true] %s16_s14 }
   0x3   :  { %s18_s16 = sshll.u32 %s206_s15, 4  ;;  %s26_s19 = sshll.u32 %s244_s1, 4  ;;  %s19_s16 = int_to_ptr.vmem [resolvable:$true] %s18_s16  ;;  %s27_s19 = int_to_ptr.hbm [resolvable:$true] %s26_s19 }
   0x4   :  { %21 = dma.hbm_to_vmem [thread:$0]  %s17_s14, 128, %s19_s16, [#allocation3]  }
   0x5   :  { %s207_s20 = smov [#allocation5]   ;;  %s208_s22 = smov 128  }
   0x6   :  { %s28_s21 = sshll.u32 %s207_s20, 4  ;;  %s209_s23 = smov 8   ;;  %s29_s21 = int_to_ptr.vmem [resolvable:$true] %s28_s21 }
   0x7   :  { %34 = dma.hbm_to_vmem [thread:$0]  %s27_s19, 2048, %s29_s21, [#allocation6], %s208_s22, %s208_s22, %s209_s23  }
   0x8   :  { %200 = dma.done.wait [#allocation3], 128  }
   0x9   :  { %201 = vsyncadd [#allocation3], 4294967168 }
   0xa   :  { %202 = dma.done.wait [#allocation6], 2048  }
   0xb   :  { %203 = vsyncadd [#allocation6], 4294965248  ;;  %v68_v0 = vld [vmem:[#allocation5 + $0x78] sm:$0xff]  ;;  %v67_v1 = vld [vmem:[#allocation5 + $0x70] sm:$0xff]  ;;  %s210_s24 = smov [#allocation7]   ;;  %s108_s28 = sshll.u32 %s246_s3, 4  ;;  %s109_s28 = int_to_ptr.hbm [resolvable:$true] %s108_s28 }
   0xc   :  { %69 = vmatpush.msra.mxu0 %v68_v0  ;;  %v66_v2 = vld [vmem:[#allocation5 + $0x68] sm:$0xff]  ;;  %v65_v3 = vld [vmem:[#allocation5 + $0x60] sm:$0xff]  ;;  %v64_v4 = vld [vmem:[#allocation5 + $0x58] sm:$0xff]  ;;  %s106_s25 = sshll.u32 %s210_s24, 4  ;;  %s107_s25 = int_to_ptr.vmem [resolvable:$true] %s106_s25 }
   0xd   :  { %v63_v5 = vld [vmem:[#allocation5 + $0x50] sm:$0xff]  ;;  %v62_v6 = vld [vmem:[#allocation5 + $0x48] sm:$0xff]  ;;  %v61_v7 = vld [vmem:[#allocation5 + $0x40] sm:$0xff] }
   0xe   :  { %70 = vmatpush.msra.mxu0 %v67_v1  ;;  %v60_v8 = vld [vmem:[#allocation5 + $0x38] sm:$0xff]  ;;  %v59_v9 = vld [vmem:[#allocation5 + $0x30] sm:$0xff]  ;;  %v58_v10 = vld [vmem:[#allocation5 + $0x28] sm:$0xff] }
   0xf   :  { %v57_v11 = vld [vmem:[#allocation5 + $0x20] sm:$0xff]  ;;  %v50_v12 = vld [vmem:[#allocation2] sm:$0xff]  ;;  %v55_v14 = vld [vmem:[#allocation5 + $0x10] sm:$0xff] }
  0x10   :  { %71 = vmatpush.msra.mxu0 %v66_v2  ;;  %v56_v13 = vld [vmem:[#allocation5 + $0x18] sm:$0xff]  ;;  %126 = vtanh.f32 %v50_v12  ;;  %v54_v15 = vld [vmem:[#allocation5 + $0x8] sm:$0xff]  ;;  %v53_v16 = vld [vmem:[#allocation5] sm:$0xff] }
  0x11   :  { %v125_v18 = vld [vmem:[%s245_s2] ss:$0 sm:$0xff] }
  0x12   :  { %72 = vmatpush.msra.mxu0 %v65_v3 }
  0x14   :  { %73 = vmatpush.msra.mxu0 %v64_v4 }
  0x16   :  { %74 = vmatpush.msra.mxu0 %v63_v5  ;;  %v127_v17 = vpop.eup %126 }
  0x18   :  { %75 = vmatpush.msra.mxu0 %v62_v6 }
  0x1a   :  { %76 = vmatpush.msra.mxu0 %v61_v7 }
  0x1c   :  { %77 = vmatpush.msra.mxu0 %v60_v8 }
  0x1e   :  { %78 = vmatpush.msra.mxu0 %v59_v9 }
  0x20   :  { %79 = vmatpush.msra.mxu0 %v58_v10 }
  0x22   :  { %80 = vmatpush.msra.mxu0 %v57_v11 }
  0x24   :  { %81 = vmatpush.msra.mxu0 %v56_v13 }
  0x26   :  { %82 = vmatpush.msra.mxu0 %v55_v14 }
  0x28   :  { %83 = vmatpush.msra.mxu0 %v54_v15 }
  0x2a   :  { %84 = vmatpush.msra.mxu0 %v53_v16 }
  0x2b   :  { %85 = vmatmul.f32.vlgmr.msra.gmra.mxu0 %v127_v17 }
  0xa8   :  { %v86_v19 = vpop.f32.mrf.mxu0 }
  0xa9   :  { %v99_v20 = vadd.f32 %v125_v18, %v86_v19 }
  0xab   :  { %100 = vst [vmem:[#allocation7] sm:$0xff] %v99_v20 }
  0xac   :  { %111 = dma.vmem_to_hbm [thread:$0]  %s107_s25, 128, %s109_s28, [#allocation4]  }
  0xad   :  { %204 = dma.done.wait [#allocation4], 128  }
  0xae   :  { %205 = vsyncadd [#allocation4], 4294967168 }
  0xaf   :  { %116 = vsyncpa [#allocation3], 1 }
  0xb0   :  { %117 = vsyncpa [#allocation6], 1 }
  0xb1   :  { %118 = vsyncpa [#allocation4], 1 }

</bundles_post_ra>
